<compile_context>
chip_gen: v7x
topology: tpu7x:2x2x1
jax: 0.10.0
libtpu: 0.0.40
codegen_flags: <defaults>
</compile_context>

<pallas_src>
import functools
import math

import jax
import jax.numpy as jnp
from jax import lax
from jax.experimental import pallas as pl
from jax.experimental.pallas import tpu as pltpu


def _num_tensorcores():
    """Best-effort TensorCore count per chip (2 only on multi-TC parts)."""
    try:
        kind = jax.devices()[0].device_kind.lower()
    except Exception:
        return 1
    return 2 if "v7" in kind else 1


def _rmsle_sum_kernel(pred_ref, actual_ref, out_ref, acc_ref, *,
                      steps_per_core, block_rows, valid_rows, sub_groups):
    """Per-core accumulation of sum((log(clamp_min(p,-0.999)+1) - log(a+1))**2)."""
    c = pl.program_id(0)   # parallel (core) axis
    s = pl.program_id(1)   # arbitrary (streaming / reduction) axis

    acc_rows, width = acc_ref.shape

    @pl.when(s == 0)
    def _():
        acc_ref[...] = jnp.zeros_like(acc_ref)

    p = pred_ref[...].astype(jnp.float32)
    a = actual_ref[...].astype(jnp.float32)

    lp = jnp.log(jnp.maximum(p, -0.999) + 1.0)
    la = jnp.log(a + 1.0)
    diff = lp - la
    sq = diff * diff

    def accumulate(vals):
        # Tree-add 8-row sublane groups into the small slab: tile-aligned
        # static slices, pure VPU adds, no cross-lane (XLU) work in the hot loop.
        part = vals[0:acc_rows, :]
        for g in range(1, sub_groups):
            part = part + vals[g * acc_rows:(g + 1) * acc_rows, :]
        acc_ref[...] += part

    row_start = (c * steps_per_core + s) * block_rows

    # Full interior blocks: plain accumulate, no iota/mask on the hot path.
    @pl.when(row_start + block_rows <= valid_rows)
    def _():
        accumulate(sq)

    # Tail block of the stream and revisited (index-clamped) blocks: mask rows
    # past the real data before accumulating (also squashes NaNs from garbage
    # rows of a partial boundary block).
    @pl.when(row_start + block_rows > valid_rows)
    def _():
        row_ids = row_start + lax.broadcasted_iota(jnp.int32, sq.shape, 0)
        accumulate(jnp.where(row_ids < valid_rows, sq, 0.0))

    @pl.when(s == steps_per_core - 1)
    def _():
        acc = acc_ref[...]
        # Fold lane groups down to one (acc_rows, 128) slab (cross-vreg adds
        # only); the tiny final cross-lane sum happens in the wrapper.
        res = acc[:, 0:128]
        for g in range(1, width // 128):
            res = res + acc[:, g * 128:(g + 1) * 128]
        out_ref[...] = res


def rmsle_loss(pred, actual, squared=True, *, block_bytes=4 * 1024 * 1024):
    assert pred.shape == actual.shape, "pred/actual must have the same shape"
    shape = pred.shape
    n_rows = int(math.prod(shape[:-1]))        # denominator of the .mean()
    n_elems = int(math.prod(shape))

    # Lane-dense flat view.  If n_elems is not a multiple of 128, pad the
    # <=127-element flat tail of BOTH inputs with 0: log(max(0,-0.999)+1)=0 and
    # log(0+1)=0, so padded elements contribute exactly 0 to the sum.
    flat_pred = pred.reshape(-1)
    flat_actual = actual.reshape(-1)
    pad = (-n_elems) % 128
    if pad:
        flat_pred = jnp.pad(flat_pred, (0, pad))
        flat_actual = jnp.pad(flat_actual, (0, pad))
    total = n_elems + pad

    width = 128
    for w in (1024, 512, 256, 128):
        if total % w == 0:
            width = w
            break
    rows = total // width

    pred2 = flat_pred.reshape(rows, width)
    actual2 = flat_actual.reshape(rows, width)

    itemsize = jnp.dtype(pred.dtype).itemsize

    # Row tile: ~block_bytes per input block, multiple of 8 rows (or the full
    # row count for tiny inputs) so the (8,128) block constraint holds.
    if rows <= 8:
        tr = rows
    else:
        tr = max(8, (block_bytes // (width * itemsize)) // 8 * 8)
        tr = min(tr, ((rows + 7) // 8) * 8)

    num_blocks = pl.cdiv(rows, tr)

    num_cores = _num_tensorcores()
    num_cores = max(1, min(num_cores, num_blocks))
    if tr % 8 != 0:
        num_cores = 1   # tiny inputs: keep every block (8,128)-legal on 1 core

    steps = pl.cdiv(num_blocks, num_cores)     # streaming steps per core
    last_block = num_blocks - 1

    acc_rows = 8 if tr % 8 == 0 else tr
    sub_groups = tr // acc_rows

    def in_map(c, s):
        # Clamp so no block origin lands past the array; clamped (revisited)
        # blocks are fully masked inside the kernel.
        return (jnp.minimum(c * steps + s, last_block), 0)

    kernel = functools.partial(
        _rmsle_sum_kernel,
        steps_per_core=steps, block_rows=tr, valid_rows=rows,
        sub_groups=sub_groups)

    # 2 inputs x 2 pipeline buffers + room for a few block-sized elementwise
    # temporaries; clamp so we stay well under v7x's 64 MiB physical VMEM.
    buf_bytes = tr * width * itemsize
    vmem_limit = int(min(48 * 1024 * 1024,
                         max(32 * 1024 * 1024, 8 * buf_bytes + 4 * 1024 * 1024)))

    partials = pl.pallas_call(
        kernel,
        out_shape=jax.ShapeDtypeStruct((num_cores * acc_rows, 128), jnp.float32),
        grid_spec=pltpu.PrefetchScalarGridSpec(
            num_scalar_prefetch=0,
            grid=(num_cores, steps),
            in_specs=[
                pl.BlockSpec((tr, width), in_map),
                pl.BlockSpec((tr, width), in_map),
            ],
            out_specs=pl.BlockSpec((acc_rows, 128), lambda c, s: (c, 0)),
            scratch_shapes=[pltpu.VMEM((acc_rows, width), jnp.float32)],
        ),
        compiler_params=pltpu.CompilerParams(
            dimension_semantics=("parallel", "arbitrary"),
            vmem_limit_bytes=vmem_limit,
        ),
    )(pred2, actual2)

    mse = jnp.sum(partials) / jnp.float32(n_rows)
    return jnp.sqrt(mse) if squared else mse


def rmsle_ref(pred, actual, squared=True):
    lp = jnp.log(jnp.maximum(pred, -0.999) + 1.0)
    la = jnp.log(actual + 1.0)
    mse = jnp.mean(jnp.sum((lp - la) ** 2, axis=-1))
    return jnp.sqrt(mse) if squared else mse


if __name__ == "__main__":
    key = jax.random.PRNGKey(0)

    cases = [
        # (shape, squared, block_bytes)
        ((2, 4, 16), True, 4 * 1024 * 1024),    # 128 elems: lane-dense (1,128), 1 block
        ((2, 4, 16), False, 4 * 1024 * 1024),   # MSLE path (no sqrt)
        ((3, 5, 48), True, 4 * 1024 * 1024),    # 720 elems: zero tail pad -> (3,256)
        ((2, 300, 128), True, 4 * 1024 * 1024), # (75,1024): single block + row-tail mask
        ((20, 1024), True, 64 * 1024),          # small tile: multi-step stream + tail mask
    ]

    for shape, squared, bb in cases:
        key, k1, k2 = jax.random.split(key, 3)
        pred = jax.random.uniform(k1, shape, jnp.float32, minval=-2.0, maxval=5.0)
        actual = jax.random.uniform(k2, shape, jnp.float32, minval=0.0, maxval=5.0)

        out = jax.block_until_ready(
            rmsle_loss(pred, actual, squared=squared, block_bytes=bb))
        expect = rmsle_ref(pred, actual, squared=squared)
        assert jnp.allclose(out, expect, rtol=1e-4, atol=1e-6), (shape, out, expect)

    print("KERNEL_OK")
</pallas_src>

<mosaic_0001>
module attributes {stable_mosaic.version = 11 : i64} {
  func.func @_rmsle_sum_kernel(%arg0: i32, %arg1: i32, %arg2: memref<1x128xf32, #tpu.memory_space<vmem>>, %arg3: memref<1x128xf32, #tpu.memory_space<vmem>>, %arg4: memref<1x128xf32, #tpu.memory_space<vmem>>, %arg5: memref<1x128xf32, #tpu.memory_space<vmem>>) attributes {dimension_semantics = [#tpu.dimension_semantics<parallel>, #tpu.dimension_semantics<arbitrary>], iteration_bounds = array<i64: 1, 1>, scalar_prefetch = 0 : i64, scratch_operands = 1 : i64, tpu.core_type = #tpu.core_type<tc>, window_params = [{transform_indices = @transform_0, window_bounds = array<i64: 1, 128>}, {transform_indices = @transform_1, window_bounds = array<i64: 1, 128>}, {transform_indices = @transform_2, window_bounds = array<i64: 1, 128>}]} {
    %c0_i32 = arith.constant 0 : i32
    %0 = arith.cmpi eq, %arg1, %c0_i32 : i32
    %1 = arith.extui %0 : i1 to i32
    %c0_i32_0 = arith.constant 0 : i32
    %2 = arith.cmpi ne, %1, %c0_i32_0 : i32
    scf.if %2 {
      %cst_15 = arith.constant 0.000000e+00 : f32
      %29 = vector.broadcast %cst_15 : f32 to vector<1x128xf32>
      %c0_16 = arith.constant 0 : index
      %c0_17 = arith.constant 0 : index
      %30 = vector.load %arg5[%c0_16, %c0_17] : memref<1x128xf32, #tpu.memory_space<vmem>>, vector<1x128xf32>
      tpu.vector_store %arg5[%c0_16, %c0_17], %29 {strides = array<i32>} : memref<1x128xf32, #tpu.memory_space<vmem>>, vector<1x128xf32>,
    } else {
    }
    %c0 = arith.constant 0 : index
    %c0_1 = arith.constant 0 : index
    %3 = vector.load %arg2[%c0, %c0_1] : memref<1x128xf32, #tpu.memory_space<vmem>>, vector<1x128xf32>
    %c0_2 = arith.constant 0 : index
    %c0_3 = arith.constant 0 : index
    %4 = vector.load %arg3[%c0_2, %c0_3] : memref<1x128xf32, #tpu.memory_space<vmem>>, vector<1x128xf32>
    %cst = arith.constant -9.990000e-01 : f32
    %5 = vector.broadcast %cst : f32 to vector<1x128xf32>
    %6 = arith.maximumf %3, %5 : vector<1x128xf32>
    %cst_4 = arith.constant 1.000000e+00 : f32
    %7 = vector.broadcast %cst_4 : f32 to vector<1x128xf32>
    %8 = arith.addf %6, %7 : vector<1x128xf32>
    %9 = math.log %8 : vector<1x128xf32>
    %cst_5 = arith.constant 1.000000e+00 : f32
    %10 = vector.broadcast %cst_5 : f32 to vector<1x128xf32>
    %11 = arith.addf %4, %10 : vector<1x128xf32>
    %12 = math.log %11 : vector<1x128xf32>
    %13 = arith.subf %9, %12 : vector<1x128xf32>
    %14 = arith.mulf %13, %13 : vector<1x128xf32>
    %c1_i32 = arith.constant 1 : i32
    %15 = arith.muli %arg0, %c1_i32 : i32
    %16 = arith.addi %15, %arg1 : i32
    %c1_i32_6 = arith.constant 1 : i32
    %17 = arith.muli %16, %c1_i32_6 : i32
    %c1_i32_7 = arith.constant 1 : i32
    %18 = arith.addi %17, %c1_i32_7 : i32
    %c1_i32_8 = arith.constant 1 : i32
    %19 = arith.cmpi sle, %18, %c1_i32_8 : i32
    %20 = arith.extui %19 : i1 to i32
    %c0_i32_9 = arith.constant 0 : i32
    %21 = arith.cmpi ne, %20, %c0_i32_9 : i32
    scf.if %21 {
      %c0_15 = arith.constant 0 : index
      %c0_16 = arith.constant 0 : index
      %29 = vector.load %arg5[%c0_15, %c0_16] : memref<1x128xf32, #tpu.memory_space<vmem>>, vector<1x128xf32>
      %30 = arith.addf %29, %14 : vector<1x128xf32>
      %c0_17 = arith.constant 0 : index
      %c0_18 = arith.constant 0 : index
      %31 = vector.load %arg5[%c0_17, %c0_18] : memref<1x128xf32, #tpu.memory_space<vmem>>, vector<1x128xf32>
      tpu.vector_store %arg5[%c0_17, %c0_18], %30 {strides = array<i32>} : memref<1x128xf32, #tpu.memory_space<vmem>>, vector<1x128xf32>,
    } else {
    }
    %c1_i32_10 = arith.constant 1 : i32
    %22 = arith.addi %17, %c1_i32_10 : i32
    %c1_i32_11 = arith.constant 1 : i32
    %23 = arith.cmpi sgt, %22, %c1_i32_11 : i32
    %24 = arith.extui %23 : i1 to i32
    %c0_i32_12 = arith.constant 0 : i32
    %25 = arith.cmpi ne, %24, %c0_i32_12 : i32
    scf.if %25 {
      %29 = tpu.iota {dimensions = array<i32: 0>} : vector<1x128xi32>
      %30 = vector.broadcast %17 : i32 to vector<1x128xi32>
      %31 = arith.addi %30, %29 : vector<1x128xi32>
      %c1_i32_15 = arith.constant 1 : i32
      %32 = vector.broadcast %c1_i32_15 : i32 to vector<1x128xi32>
      %33 = arith.cmpi slt, %31, %32 : vector<1x128xi32>
      %cst_16 = arith.constant 0.000000e+00 : f32
      %34 = vector.broadcast %cst_16 : f32 to vector<1x128xf32>
      %35 = arith.select %33, %14, %34 : vector<1x128xi1>, vector<1x128xf32>
      %c0_17 = arith.constant 0 : index
      %c0_18 = arith.constant 0 : index
      %36 = vector.load %arg5[%c0_17, %c0_18] : memref<1x128xf32, #tpu.memory_space<vmem>>, vector<1x128xf32>
      %37 = arith.addf %36, %35 : vector<1x128xf32>
      %c0_19 = arith.constant 0 : index
      %c0_20 = arith.constant 0 : index
      %38 = vector.load %arg5[%c0_19, %c0_20] : memref<1x128xf32, #tpu.memory_space<vmem>>, vector<1x128xf32>
      tpu.vector_store %arg5[%c0_19, %c0_20], %37 {strides = array<i32>} : memref<1x128xf32, #tpu.memory_space<vmem>>, vector<1x128xf32>,
    } else {
    }
    %c0_i32_13 = arith.constant 0 : i32
    %26 = arith.cmpi eq, %arg1, %c0_i32_13 : i32
    %27 = arith.extui %26 : i1 to i32
    %c0_i32_14 = arith.constant 0 : i32
    %28 = arith.cmpi ne, %27, %c0_i32_14 : i32
    scf.if %28 {
      %c0_15 = arith.constant 0 : index
      %c0_16 = arith.constant 0 : index
      %29 = vector.load %arg5[%c0_15, %c0_16] : memref<1x128xf32, #tpu.memory_space<vmem>>, vector<1x128xf32>
      %c0_17 = arith.constant 0 : index
      %c0_18 = arith.constant 0 : index
      %30 = vector.load %arg4[%c0_17, %c0_18] : memref<1x128xf32, #tpu.memory_space<vmem>>, vector<1x128xf32>
      tpu.vector_store %arg4[%c0_17, %c0_18], %29 {strides = array<i32>} : memref<1x128xf32, #tpu.memory_space<vmem>>, vector<1x128xf32>,
    } else {
    }
    return
  }
  func.func @transform_0(%arg0: i32, %arg1: i32) -> (i32, i32) {
    %c1_i32 = arith.constant 1 : i32
    %0 = arith.muli %arg0, %c1_i32 : i32
    %1 = arith.addi %0, %arg1 : i32
    %c0_i32 = arith.constant 0 : i32
    %2 = arith.minsi %1, %c0_i32 : i32
    %c0_i32_0 = arith.constant 0 : i32
    %c0_i32_1 = arith.constant 0 : i32
    return %2, %c0_i32_0 : i32, i32
  }
  func.func @transform_1(%arg0: i32, %arg1: i32) -> (i32, i32) {
    %c1_i32 = arith.constant 1 : i32
    %0 = arith.muli %arg0, %c1_i32 : i32
    %1 = arith.addi %0, %arg1 : i32
    %c0_i32 = arith.constant 0 : i32
    %2 = arith.minsi %1, %c0_i32 : i32
    %c0_i32_0 = arith.constant 0 : i32
    %c0_i32_1 = arith.constant 0 : i32
    return %2, %c0_i32_0 : i32, i32
  }
  func.func @transform_2(%arg0: i32, %arg1: i32) -> (i32, i32) {
    %c0_i32 = arith.constant 0 : i32
    %c0_i32_0 = arith.constant 0 : i32
    return %arg0, %c0_i32 : i32, i32
  }
}

</mosaic_0001>

<bundles_post_ra>
// kernel: tpu_custom_call.1
= control target key start
LH: loop header
LB: loop body
LE: loop exit
PB: predicated region body
PF: predicated region fallthrough
CT: control target
= control target key end

     0   :  { %7 = vsyncpa [#allocation4], 0  ;;  %s219_s0 = inlined_call_operand.hbm [shape: f32[1,128], index: 0, kind: input, shape index: {}]   ;;  %s220_s1 = inlined_call_operand.vmem [shape: f32[1,128], index: 1, kind: input, shape index: {}]   ;;  %s221_s2 = inlined_call_operand.hbm [shape: f32[1,128], index: 2, kind: output, shape index: {}]  }
   0x1   :  { %8 = vsyncpa [#allocation5], 0  ;;  %s174_s9 = smov [#allocation3]   ;;  %s126_s13 = scalar_lea.hbm %s219_s0, 16 }
   0x2   :  { %s20_s10 = sshll.u32 %s174_s9, 4  ;;  %p127_p0 = scmp.ne.s32.totalorder %s219_s0, %s126_s13  ;;  %s21_s10 = int_to_ptr.vmem [resolvable:$true] %s20_s10 }
   0x3   :  { %p130_p1 = scmp.lt.u32.totalorder %s126_s13, %s219_s0 }
   0x5   :  { %p132_p2 = pnand %p130_p1, %p127_p0 }
   0x7   :  { %135 = shalt.err (!%p132_p2)
}
   0x8   :  { %s136_s18 = scalar_lea.vmem %s21_s10, 16  ;;  %s140_s19 = scalar_lea.vmem %s21_s10, 32 }
   0x9   :  { %p137_p3 = scmp.ne.s32.totalorder %s21_s10, %s136_s18  ;;  %p141_p4 = scmp.lt.s32.totalorder %s21_s10, %s21_s10 }
   0xa   :  { %p142_p5 = scmp.lt.s32.totalorder %s140_s19, %s136_s18 }
   0xc   :  { %p143_p6 = por %p142_p5, %p141_p4 }
   0xe   :  { %p144_p7 = pnand %p143_p6, %p137_p3 }
  0x10   :  { %147 = shalt.err (!%p144_p7)
}
  0x11   :  { %23 = dma.hbm_to_vmem [thread:$0]  %s219_s0, 16, %s21_s10, [#allocation4]  }
  0x12   :  { %170 = dma.done.wait [#allocation4], 16  }
  0x13   :  { %171 = vsyncadd [#allocation4], 4294967280  ;;  %v175_v0 = vmov 0.0   ;;  %v61_v1 = vld [vmem:[#allocation3] sm:$0x1]  ;;  %s176_s0 = smov [#allocation6]  }
  0x14   :  { %60 = vst [vmem:[#allocation2] sm:$0x1] %v175_v0  ;;  %v62_v2 = vld [vmem:[%s220_s1] sm:$0x1]  ;;  %v63_v3 = vmax.f32 %v61_v1, -0.999 }
  0x15   :  { %v67_v4 = vadd.f32 1.0, %v62_v2  ;;  %s105_s24 = sshll.u32 %s176_s0, 4  ;;  %s106_s24 = int_to_ptr.vmem [resolvable:$true] %s105_s24 }
  0x16   :  { %v64_v5 = vadd.f32 1.0, %v63_v3  ;;  %s148_s1 = scalar_lea.vmem %s106_s24, 16  ;;  %s152_s25 = scalar_lea.vmem %s106_s24, 32 }
  0x17   :  { %122 = vlog2.f32 %v67_v4  ;;  %p149_p8 = scmp.ne.s32.totalorder %s106_s24, %s148_s1  ;;  %p153_p9 = scmp.lt.s32.totalorder %s106_s24, %s106_s24 }
  0x18   :  { %124 = vlog2.f32 %v64_v5  ;;  %p154_p10 = scmp.lt.s32.totalorder %s152_s25, %s148_s1 }
  0x1a   :  { %p155_p11 = por %p154_p10, %p153_p9 }
  0x1b   :  { %v78_v11 = vld [vmem:[#allocation2] sm:$0x1] }
  0x1c   :  { %p156_p12 = pnand %p155_p11, %p149_p8 }
  0x21   :  { %v123_v6 = vpop.eup %122 }
  0x22   :  { %v69_v7 = vmul.f32 0.6931472, %v123_v6  ;;  %v125_v8 = vpop.eup %124 }
  0x23   :  { %v66_v9 = vmul.f32 0.6931472, %v125_v8 }
  0x25   :  { %v70_v10 = vsub.f32 %v66_v9, %v69_v7 }
  0x27   :  { %v71_v12 = vmul.f32 %v70_v10, %v70_v10 }
  0x29   :  { %v79_v13 = vadd.f32 %v78_v11, %v71_v12 }
  0x2b   :  { %80 = vst [vmem:[#allocation2] sm:$0x1] %v79_v13 }
  0x32   :  { %v97_v14 = vld [vmem:[#allocation2] sm:$0x1] }
  0x33   :  { %98 = vst [vmem:[#allocation6] sm:$0x1] %v97_v14 }
  0x34   :  { %159 = shalt.err (!%p156_p12)
}
  0x35   :  { %s160_s28 = scalar_lea.hbm %s221_s2, 16 }
  0x36   :  { %p161_p13 = scmp.ne.s32.totalorder %s221_s2, %s160_s28  ;;  %p164_p0 = scmp.lt.u32.totalorder %s160_s28, %s221_s2 }
  0x38   :  { %p166_p1 = pnand %p164_p0, %p161_p13 }
  0x3a   :  { %169 = shalt.err (!%p166_p1)
}
  0x3b   :  { %108 = dma.vmem_to_hbm [thread:$0]  %s106_s24, 16, %s221_s2, [#allocation5]  }
  0x3c   :  { %172 = dma.done.wait [#allocation5], 16  }
  0x3d   :  { %173 = vsyncadd [#allocation5], 4294967280 }
  0x3e   :  { %112 = vsyncpa [#allocation4], 1 }
  0x3f   :  { %113 = vsyncpa [#allocation5], 1 }

</bundles_post_ra>
